<compile_context>
chip_gen: v5e
topology: v5e:2x2
jax: 0.10.0
libtpu: 0.0.40
codegen_flags: <defaults>
</compile_context>

<pallas_src>
import jax
import jax.numpy as jnp
from jax.experimental import pallas as pl
from jax.experimental.pallas import tpu as pltpu


def mlp_kernel(x_ref, w1_ref, b1_ref, w2_ref, b2_ref, w3_ref, b3_ref, o_ref):
    w_dtype = w1_ref.dtype  # bf16 on the fast path, f32 otherwise
    # Layer 1: Linear(270, 128) + ReLU  (MXU accumulates in f32, epilogue f32)
    h1 = jnp.dot(x_ref[...], w1_ref[...], preferred_element_type=jnp.float32)
    h1 = jnp.maximum(h1 + b1_ref[...], 0.0)
    # Layer 2: Linear(128, 64) + ReLU
    h2 = jnp.dot(h1.astype(w_dtype), w2_ref[...], preferred_element_type=jnp.float32)
    h2 = jnp.maximum(h2 + b2_ref[...], 0.0)
    # Layer 3: Linear(64, 3)
    out = jnp.dot(h2.astype(w_dtype), w3_ref[...], preferred_element_type=jnp.float32)
    o_ref[...] = (out + b3_ref[...]).astype(o_ref.dtype)


def _round_up(n, m):
    return ((n + m - 1) // m) * m


def simple_mlp2(x, params, *, tb=1024, use_bf16=True):
    """x: [B, 270] float32. params: w as [in, out], b as [1, out] (f32).

    tb:       batch tile size (rows per grid step); must be a multiple of 8.
    use_bf16: cast x and weights to bf16 (HBM / MXU-rate win); accumulation and the
              bias+ReLU epilogue stay f32.
    """
    assert tb % 8 == 0, "batch tile must be a multiple of 8 (sublane constraint)"
    w1, b1, w2, b2, w3, b3 = (params["w1"], params["b1"], params["w2"],
                              params["b2"], params["w3"], params["b3"])
    B, F_in = x.shape
    d_out = w3.shape[1]

    compute_dtype = jnp.bfloat16 if use_bf16 else jnp.float32
    xc = x.astype(compute_dtype)
    w1c, w2c, w3c = (w.astype(compute_dtype) for w in (w1, w2, w3))
    # Biases stay f32: the epilogue (bias add + ReLU + final add) is f32 everywhere.
    b1f, b2f, b3f = (b.astype(jnp.float32) for b in (b1, b2, b3))

    # Clamp the tile for tiny batches, then pad B up to a multiple of the tile so
    # every grid step is a full tile (no masked row extents).
    TB = min(tb, _round_up(B, 8))
    Bp = _round_up(B, TB)
    if Bp != B:
        xc = jnp.pad(xc, ((0, Bp - B), (0, 0)))
    grid = (pl.cdiv(Bp, TB),)

    # Weights / biases: constant index_map -> same block every step -> VMEM-resident.
    def resident(shape):
        return pl.BlockSpec(shape, lambda i: (0, 0))

    in_specs = [
        pl.BlockSpec((TB, F_in), lambda i: (i, 0)),   # x: batch-tiled, double-buffered
        resident(w1c.shape), resident(b1f.shape),
        resident(w2c.shape), resident(b2f.shape),
        resident(w3c.shape), resident(b3f.shape),
    ]
    out_specs = pl.BlockSpec((TB, d_out), lambda i: (i, 0))

    in_bytes = jnp.dtype(compute_dtype).itemsize
    flops = 2 * Bp * (270 * 128 + 128 * 64 + 64 * 3)
    bytes_accessed = (
        Bp * F_in * in_bytes                              # read x
        + Bp * d_out * 4                                  # write output (f32)
        + sum(int(w.size) * in_bytes for w in (w1c, w2c, w3c))
        + sum(int(b.size) * 4 for b in (b1f, b2f, b3f))
    )

    out = pl.pallas_call(
        mlp_kernel,
        out_shape=jax.ShapeDtypeStruct((Bp, d_out), jnp.float32),
        grid=grid,
        in_specs=in_specs,
        out_specs=out_specs,
        compiler_params=pltpu.CompilerParams(
            dimension_semantics=("parallel",),  # megacore sharding on v7x; harmless elsewhere
        ),
        cost_estimate=pl.CostEstimate(
            flops=flops, transcendentals=0, bytes_accessed=bytes_accessed),
    )(xc, w1c, b1f, w2c, b2f, w3c, b3f)

    return out[:B] if Bp != B else out


def init_params(key):
    """Deterministic init mimicking PyTorch nn.Linear default U(-1/sqrt(fan_in), +)."""
    dims = [(270, 128), (128, 64), (64, 3)]
    params = {}
    keys = jax.random.split(key, 2 * len(dims))
    for i, (fan_in, fan_out) in enumerate(dims):
        bound = 1.0 / jnp.sqrt(float(fan_in))
        w = jax.random.uniform(keys[2 * i], (fan_in, fan_out),
                               minval=-bound, maxval=bound, dtype=jnp.float32)
        b = jax.random.uniform(keys[2 * i + 1], (1, fan_out),
                               minval=-bound, maxval=bound, dtype=jnp.float32)
        params[f"w{i + 1}"] = w
        params[f"b{i + 1}"] = b
    return params


def reference_mlp(x, p):
    h1 = jnp.maximum(x @ p["w1"] + p["b1"], 0.0)
    h2 = jnp.maximum(h1 @ p["w2"] + p["b2"], 0.0)
    return h2 @ p["w3"] + p["b3"]


if __name__ == "__main__":
    key = jax.random.PRNGKey(0)
    k_x, k_p = jax.random.split(key)
    params = init_params(k_p)

    # 1) Small, non-multiple-of-8 batch, f32 path (exercises padding + tile clamping),
    #    tight check against the f32 reference (exact module semantics).
    B = 13
    x = jax.random.normal(k_x, (B, 270), dtype=jnp.float32)
    out_f32 = jax.block_until_ready(simple_mlp2(x, params, use_bf16=False))
    ref = reference_mlp(x, params)
    assert out_f32.shape == (B, 3), out_f32.shape
    assert jnp.allclose(out_f32, ref, atol=1e-5, rtol=1e-5), "f32 mismatch vs reference"

    # 2) Multi-tile grid + bf16 fast path (small tile just to exercise several grid
    #    steps; production default is tb=1024). Looser tolerance due to bf16 operands.
    B2 = 96
    x2 = jax.random.normal(k_x, (B2, 270), dtype=jnp.float32)
    out_bf16 = jax.block_until_ready(simple_mlp2(x2, params, tb=32, use_bf16=True))
    ref2 = reference_mlp(x2, params)
    assert out_bf16.shape == (B2, 3), out_bf16.shape
    assert jnp.allclose(out_bf16, ref2, atol=3e-2, rtol=3e-2), "bf16 mismatch vs reference"

    print("KERNEL_OK")
</pallas_src>

<mosaic_0001>
module attributes {stable_mosaic.version = 11 : i64} {
  func.func @mlp_kernel(%arg0: i32, %arg1: memref<16x270xf32, #tpu.memory_space<vmem>>, %arg2: memref<270x128xf32, #tpu.memory_space<vmem>>, %arg3: memref<1x128xf32, #tpu.memory_space<vmem>>, %arg4: memref<128x64xf32, #tpu.memory_space<vmem>>, %arg5: memref<1x64xf32, #tpu.memory_space<vmem>>, %arg6: memref<64x3xf32, #tpu.memory_space<vmem>>, %arg7: memref<1x3xf32, #tpu.memory_space<vmem>>, %arg8: memref<16x3xf32, #tpu.memory_space<vmem>>) attributes {dimension_semantics = [#tpu.dimension_semantics<parallel>], iteration_bounds = array<i64: 1>, scalar_prefetch = 0 : i64, scratch_operands = 0 : i64, tpu.core_type = #tpu.core_type<tc>, window_params = [{transform_indices = @transform_0, window_bounds = array<i64: 16, 270>}, {pipeline_mode = #tpu.pipeline_mode<synchronous>, transform_indices = @transform_1, window_bounds = array<i64: 270, 128>}, {pipeline_mode = #tpu.pipeline_mode<synchronous>, transform_indices = @transform_2, window_bounds = array<i64: 1, 128>}, {pipeline_mode = #tpu.pipeline_mode<synchronous>, transform_indices = @transform_3, window_bounds = array<i64: 128, 64>}, {pipeline_mode = #tpu.pipeline_mode<synchronous>, transform_indices = @transform_4, window_bounds = array<i64: 1, 64>}, {pipeline_mode = #tpu.pipeline_mode<synchronous>, transform_indices = @transform_5, window_bounds = array<i64: 64, 3>}, {pipeline_mode = #tpu.pipeline_mode<synchronous>, transform_indices = @transform_6, window_bounds = array<i64: 1, 3>}, {transform_indices = @transform_7, window_bounds = array<i64: 16, 3>}]} {
    %c0 = arith.constant 0 : index
    %c0_0 = arith.constant 0 : index
    %0 = vector.load %arg1[%c0, %c0_0] : memref<16x270xf32, #tpu.memory_space<vmem>>, vector<16x270xf32>
    %c0_1 = arith.constant 0 : index
    %c0_2 = arith.constant 0 : index
    %1 = vector.load %arg2[%c0_1, %c0_2] : memref<270x128xf32, #tpu.memory_space<vmem>>, vector<270x128xf32>
    %cst = arith.constant dense<0.000000e+00> : vector<16x128xf32>
    %2 = tpu.matmul %0, %1, %cst {dimension_numbers = #tpu.dot_dimension_numbers<[1], [0], [0], [1], [0, 0, 1, 1], [], []>} : vector<16x270xf32>, vector<270x128xf32>, vector<16x128xf32> -> vector<16x128xf32>
    %c0_3 = arith.constant 0 : index
    %c0_4 = arith.constant 0 : index
    %3 = vector.load %arg3[%c0_3, %c0_4] : memref<1x128xf32, #tpu.memory_space<vmem>>, vector<1x128xf32>
    %4 = vector.broadcast %3 : vector<1x128xf32> to vector<16x128xf32>
    %5 = arith.addf %2, %4 : vector<16x128xf32>
    %cst_5 = arith.constant 0.000000e+00 : f32
    %6 = vector.broadcast %cst_5 : f32 to vector<16x128xf32>
    %7 = arith.maximumf %5, %6 : vector<16x128xf32>
    %c0_6 = arith.constant 0 : index
    %c0_7 = arith.constant 0 : index
    %8 = vector.load %arg4[%c0_6, %c0_7] : memref<128x64xf32, #tpu.memory_space<vmem>>, vector<128x64xf32>
    %cst_8 = arith.constant dense<0.000000e+00> : vector<16x64xf32>
    %9 = tpu.matmul %7, %8, %cst_8 {dimension_numbers = #tpu.dot_dimension_numbers<[1], [0], [0], [1], [0, 0, 1, 1], [], []>} : vector<16x128xf32>, vector<128x64xf32>, vector<16x64xf32> -> vector<16x64xf32>
    %c0_9 = arith.constant 0 : index
    %c0_10 = arith.constant 0 : index
    %10 = vector.load %arg5[%c0_9, %c0_10] : memref<1x64xf32, #tpu.memory_space<vmem>>, vector<1x64xf32>
    %11 = vector.broadcast %10 : vector<1x64xf32> to vector<16x64xf32>
    %12 = arith.addf %9, %11 : vector<16x64xf32>
    %cst_11 = arith.constant 0.000000e+00 : f32
    %13 = vector.broadcast %cst_11 : f32 to vector<16x64xf32>
    %14 = arith.maximumf %12, %13 : vector<16x64xf32>
    %c0_12 = arith.constant 0 : index
    %c0_13 = arith.constant 0 : index
    %15 = vector.load %arg6[%c0_12, %c0_13] : memref<64x3xf32, #tpu.memory_space<vmem>>, vector<64x3xf32>
    %cst_14 = arith.constant dense<0.000000e+00> : vector<16x3xf32>
    %16 = tpu.matmul %14, %15, %cst_14 {dimension_numbers = #tpu.dot_dimension_numbers<[1], [0], [0], [1], [0, 0, 1, 1], [], []>} : vector<16x64xf32>, vector<64x3xf32>, vector<16x3xf32> -> vector<16x3xf32>
    %c0_15 = arith.constant 0 : index
    %c0_16 = arith.constant 0 : index
    %17 = vector.load %arg7[%c0_15, %c0_16] : memref<1x3xf32, #tpu.memory_space<vmem>>, vector<1x3xf32>
    %18 = vector.broadcast %17 : vector<1x3xf32> to vector<16x3xf32>
    %19 = arith.addf %16, %18 : vector<16x3xf32>
    %c0_17 = arith.constant 0 : index
    %c0_18 = arith.constant 0 : index
    %20 = vector.load %arg8[%c0_17, %c0_18] : memref<16x3xf32, #tpu.memory_space<vmem>>, vector<16x3xf32>
    tpu.vector_store %arg8[%c0_17, %c0_18], %19 {strides = array<i32>} : memref<16x3xf32, #tpu.memory_space<vmem>>, vector<16x3xf32>,
    return
  }
  func.func @transform_0(%arg0: i32) -> (i32, i32) {
    %c0_i32 = arith.constant 0 : i32
    %c0_i32_0 = arith.constant 0 : i32
    return %arg0, %c0_i32 : i32, i32
  }
  func.func @transform_1(%arg0: i32) -> (i32, i32) {
    %c0_i32 = arith.constant 0 : i32
    %c0_i32_0 = arith.constant 0 : i32
    %c0_i32_1 = arith.constant 0 : i32
    return %c0_i32, %c0_i32_0 : i32, i32
  }
  func.func @transform_2(%arg0: i32) -> (i32, i32) {
    %c0_i32 = arith.constant 0 : i32
    %c0_i32_0 = arith.constant 0 : i32
    %c0_i32_1 = arith.constant 0 : i32
    return %c0_i32, %c0_i32_0 : i32, i32
  }
  func.func @transform_3(%arg0: i32) -> (i32, i32) {
    %c0_i32 = arith.constant 0 : i32
    %c0_i32_0 = arith.constant 0 : i32
    %c0_i32_1 = arith.constant 0 : i32
    return %c0_i32, %c0_i32_0 : i32, i32
  }
  func.func @transform_4(%arg0: i32) -> (i32, i32) {
    %c0_i32 = arith.constant 0 : i32
    %c0_i32_0 = arith.constant 0 : i32
    %c0_i32_1 = arith.constant 0 : i32
    return %c0_i32, %c0_i32_0 : i32, i32
  }
  func.func @transform_5(%arg0: i32) -> (i32, i32) {
    %c0_i32 = arith.constant 0 : i32
    %c0_i32_0 = arith.constant 0 : i32
    %c0_i32_1 = arith.constant 0 : i32
    return %c0_i32, %c0_i32_0 : i32, i32
  }
  func.func @transform_6(%arg0: i32) -> (i32, i32) {
    %c0_i32 = arith.constant 0 : i32
    %c0_i32_0 = arith.constant 0 : i32
    %c0_i32_1 = arith.constant 0 : i32
    return %c0_i32, %c0_i32_0 : i32, i32
  }
  func.func @transform_7(%arg0: i32) -> (i32, i32) {
    %c0_i32 = arith.constant 0 : i32
    %c0_i32_0 = arith.constant 0 : i32
    return %arg0, %c0_i32 : i32, i32
  }
}

</mosaic_0001>

<bundles_post_ra>
// kernel: tpu_custom_call.1
= control target key start
LH: loop header
LB: loop body
LE: loop exit
PB: predicated region body
PF: predicated region fallthrough
CT: control target
= control target key end

     0   :  { %12 = vsyncpa [#allocation3], 0  ;;  %s300_s27 = smov [#allocation2]   ;;  %s301_s29 = smov 128   ;;  %s453_s0 = inlined_call_operand.vmem [shape: f32[16,270], index: 0, kind: input, shape index: {}]   ;;  %s454_s1 = inlined_call_operand.hbm [shape: f32[270,128], index: 1, kind: input, shape index: {}]   ;;  %s455_s2 = inlined_call_operand.vmem [shape: f32[1,128], index: 2, kind: input, shape index: {}]   ;;  %s456_s3 = inlined_call_operand.vmem [shape: f32[128,64], index: 3, kind: input, shape index: {}]   ;;  %s457_s4 = inlined_call_operand.vmem [shape: f32[1,64], index: 4, kind: input, shape index: {}]   ;;  %s458_s5 = inlined_call_operand.vmem [shape: f32[64,3], index: 5, kind: input, shape index: {}]   ;;  %s459_s6 = inlined_call_operand.vmem [shape: f32[1,3], index: 6, kind: input, shape index: {}]   ;;  %s460_s7 = inlined_call_operand.vmem [shape: f32[16,3], index: 7, kind: output, shape index: {}]  }
   0x1   :  { %s19_s26 = sshll.u32 %s454_s1, 4  ;;  %s21_s28 = sshll.u32 %s300_s27, 4  ;;  %s20_s26 = int_to_ptr.hbm [resolvable:$true] %s19_s26  ;;  %s22_s28 = int_to_ptr.vmem [resolvable:$true] %s21_s28 }
   0x2   :  { %s302_s30 = smov 8  }
   0x3   :  { %27 = dma.hbm_to_vmem [thread:$0]  %s20_s26, 4352, %s22_s28, [#allocation3], %s301_s29, %s301_s29, %s302_s30  }
   0x4   :  { %298 = dma.done.wait [#allocation3], 4352  }
   0x5   :  { %299 = vsyncadd [#allocation3], 4294962944  ;;  %v63_v0 = vld [vmem:[#allocation2 + $0x78] sm:$0xff]  ;;  %v62_v1 = vld [vmem:[#allocation2 + $0x70] sm:$0xff]  ;;  %vm93_vm0 = vcmask 1045504   ;;  %vm86_vm1 = vcmask 113664  }
   0x6   :  { %v79_v2 = vld [vmem:[#allocation2 + $0xf8] sm:$0xff]  ;;  %97 = vmatpush.msra.mxu0 %v63_v0  ;;  %v78_v3 = vld [vmem:[#allocation2 + $0xf0] sm:$0xff]  ;;  %v61_v4 = vld [vmem:[#allocation2 + $0x68] sm:$0xff]  ;;  %vm225_vm2 = vcmask 523264   ;;  %vm255_vm3 = vcmask 23552  }
   0x7   :  { %120 = vmatpush.msra.mxu1 %v79_v2  ;;  %v77_v5 = vld [vmem:[#allocation2 + $0xe8] sm:$0xff]  ;;  %v60_v6 = vld [vmem:[#allocation2 + $0x60] sm:$0xff]  ;;  %v59_v8 = vld [vmem:[#allocation2 + $0x58] sm:$0xff] }
   0x8   :  { %98 = vmatpush.msra.mxu0 %v62_v1  ;;  %v76_v7 = vld [vmem:[#allocation2 + $0xe0] sm:$0xff]  ;;  %v75_v9 = vld [vmem:[#allocation2 + $0xd8] sm:$0xff]  ;;  %v58_v10 = vld [vmem:[#allocation2 + $0x50] sm:$0xff] }
   0x9   :  { %121 = vmatpush.msra.mxu1 %v78_v3  ;;  %v74_v11 = vld [vmem:[#allocation2 + $0xd0] sm:$0xff]  ;;  %v81_v12 = vld [vmem:[#allocation2 + $0x108] sm:$0x3f]  ;;  %v80_v15 = vld [vmem:[#allocation2 + $0x100] sm:$0xff] }
   0xa   :  { %99 = vmatpush.msra.mxu0 %v61_v4  ;;  %v57_v13 = vld [vmem:[#allocation2 + $0x48] sm:$0xff]  ;;  %263 = vmatpush.msk.msra.mxu2 %vm93_vm0, %v81_v12  ;;  %v44_v16 = vld [vmem:[%s453_s0 + $0x10] sm:$0xff]  ;;  %v56_v17 = vld [vmem:[#allocation2 + $0x40] sm:$0xff] }
   0xb   :  { %122 = vmatpush.msra.mxu1 %v77_v5  ;;  %v73_v14 = vld [vmem:[#allocation2 + $0xc8] sm:$0xff]  ;;  %v72_v18 = vld [vmem:[#allocation2 + $0xc0] sm:$0xff]  ;;  %v183_v19 = vld [vmem:[%s456_s3 + $0x78] sm:$0xff] }
   0xc   :  { %100 = vmatpush.msra.mxu0 %v60_v6  ;;  %158 = vmatpush.msra.mxu2 %v80_v15  ;;  %v182_v20 = vld [vmem:[%s456_s3 + $0x70] sm:$0xff]  ;;  %v55_v21 = vld [vmem:[#allocation2 + $0x38] sm:$0xff]  ;;  %v181_v23 = vld [vmem:[%s456_s3 + $0x68] sm:$0xff] }
   0xd   :  { %123 = vmatpush.msra.mxu1 %v76_v7  ;;  %v71_v22 = vld [vmem:[#allocation2 + $0xb8] sm:$0xff]  ;;  %264 = vmatmul.msk.f32.vlgmr.msra.gmra.mxu2 %vm86_vm1, %v44_v16  ;;  %v54_v24 = vld [vmem:[#allocation2 + $0x30] sm:$0xff]  ;;  %v180_v26 = vld [vmem:[%s456_s3 + $0x60] sm:$0xff] }
   0xe   :  { %101 = vmatpush.msra.mxu0 %v59_v8  ;;  %188 = vmatpush.msra.mxu3 %v183_v19  ;;  %v70_v25 = vld [vmem:[#allocation2 + $0xb0] sm:$0xff]  ;;  %v53_v27 = vld [vmem:[#allocation2 + $0x28] sm:$0xff]  ;;  %v179_v30 = vld [vmem:[%s456_s3 + $0x58] sm:$0xff] }
   0xf   :  { %124 = vmatpush.msra.mxu1 %v75_v9  ;;  %v69_v28 = vld [vmem:[#allocation2 + $0xa8] sm:$0xff]  ;;  %v52_v31 = vld [vmem:[#allocation2 + $0x20] sm:$0xff]  ;;  %v178_v33 = vld [vmem:[%s456_s3 + $0x50] sm:$0xff] }
  0x10   :  { %102 = vmatpush.msra.mxu0 %v58_v10  ;;  %189 = vmatpush.msra.mxu3 %v182_v20  ;;  %v47_v29 = vld [vmem:[%s453_s0 + $0x28] sm:$0xff]  ;;  %v68_v32 = vld [vmem:[#allocation2 + $0xa0] sm:$0xff]  ;;  %v51_v34 = vld [vmem:[#allocation2 + $0x18] sm:$0xff] }
  0x11   :  { %125 = vmatpush.msra.mxu1 %v74_v11  ;;  %v67_v35 = vld [vmem:[#allocation2 + $0x98] sm:$0xff]  ;;  %v177_v36 = vld [vmem:[%s456_s3 + $0x48] sm:$0xff]  ;;  %v50_v37 = vld [vmem:[#allocation2 + $0x10] sm:$0xff] }
  0x12   :  { %103 = vmatpush.msra.mxu0 %v57_v13  ;;  %190 = vmatpush.msra.mxu3 %v181_v23  ;;  %v66_v38 = vld [vmem:[#allocation2 + $0x90] sm:$0xff]  ;;  %v176_v39 = vld [vmem:[%s456_s3 + $0x40] sm:$0xff]  ;;  %v49_v40 = vld [vmem:[#allocation2 + $0x8] sm:$0xff] }
  0x13   :  { %126 = vmatpush.msra.mxu1 %v73_v14  ;;  %v65_v41 = vld [vmem:[#allocation2 + $0x88] sm:$0xff]  ;;  %v175_v42 = vld [vmem:[%s456_s3 + $0x38] sm:$0xff]  ;;  %v48_v43 = vld [vmem:[#allocation2] sm:$0xff] }
  0x14   :  { %104 = vmatpush.msra.mxu0 %v56_v17  ;;  %191 = vmatpush.msra.mxu3 %v180_v26  ;;  %v64_v44 = vld [vmem:[#allocation2 + $0x80] sm:$0xff]  ;;  %v43_v46 = vld [vmem:[%s453_s0 + $0x8] sm:$0xff]  ;;  %v174_v47 = vld [vmem:[%s456_s3 + $0x30] sm:$0xff] }
  0x15   :  { %127 = vmatpush.msra.mxu1 %v72_v18  ;;  %265 = vmatmul.msk.f32.gmra.mxu2 %vm86_vm1, %v47_v29  ;;  %v42_v45 = vld [vmem:[%s453_s0] sm:$0xff]  ;;  %v173_v48 = vld [vmem:[%s456_s3 + $0x28] sm:$0xff]  ;;  %v45_v49 = vld [vmem:[%s453_s0 + $0x18] sm:$0xff] }
  0x16   :  { %105 = vmatpush.msra.mxu0 %v55_v21  ;;  %192 = vmatpush.msra.mxu3 %v179_v30  ;;  %v46_v50 = vld [vmem:[%s453_s0 + $0x20] sm:$0xff]  ;;  %v171_v52 = vld [vmem:[%s456_s3 + $0x18] sm:$0xff]  ;;  %v170_v53 = vld [vmem:[%s456_s3 + $0x10] sm:$0xff] }
  0x17   :  { %128 = vmatpush.msra.mxu1 %v71_v22  ;;  %v172_v51 = vld [vmem:[%s456_s3 + $0x20] sm:$0xff]  ;;  %v169_v54 = vld [vmem:[%s456_s3 + $0x8] sm:$0xff]  ;;  %v220_v56 = vld [vmem:[%s458_s5 + $0x38] sm:$0xff] }
  0x18   :  { %106 = vmatpush.msra.mxu0 %v54_v24  ;;  %193 = vmatpush.msra.mxu3 %v178_v33  ;;  %v168_v55 = vld [vmem:[%s456_s3] sm:$0xff]  ;;  %v219_v57 = vld [vmem:[%s458_s5 + $0x30] sm:$0xff]  ;;  %v218_v58 = vld [vmem:[%s458_s5 + $0x28] sm:$0xff] }
  0x19   :  { %129 = vmatpush.msra.mxu1 %v70_v25  ;;  %240 = vmatpush.msrb.mxu2 %v220_v56  ;;  %v217_v59 = vld [vmem:[%s458_s5 + $0x20] sm:$0xff]  ;;  %v216_v60 = vld [vmem:[%s458_s5 + $0x18] sm:$0xff]  ;;  %v215_v61 = vld [vmem:[%s458_s5 + $0x10] sm:$0xff] }
  0x1a   :  { %107 = vmatpush.msra.mxu0 %v53_v27  ;;  %194 = vmatpush.msra.mxu3 %v177_v36  ;;  %v271_v62 = vld [vmem:[%s455_s2] ss:$0 sm:$0xff]  ;;  %v214_v13 = vld [vmem:[%s458_s5 + $0x8] sm:$0xff] }
  0x1b   :  { %130 = vmatpush.msra.mxu1 %v69_v28  ;;  %241 = vmatpush.msrb.mxu2 %v219_v57  ;;  %v213_v14 = vld [vmem:[%s458_s5] sm:$0xff] }
  0x1c   :  { %108 = vmatpush.msra.mxu0 %v52_v31  ;;  %195 = vmatpush.msra.mxu3 %v176_v39  ;;  %v272_v15 = vld [vmem:[%s457_s4] ss:$0 sm:$0xff] }
  0x1d   :  { %131 = vmatpush.msra.mxu1 %v68_v32  ;;  %242 = vmatpush.msrb.mxu2 %v218_v58  ;;  %v273_v22 = vld [vmem:[%s459_s6] ss:$0 sm:$0xff] }
  0x1e   :  { %109 = vmatpush.msra.mxu0 %v51_v34  ;;  %196 = vmatpush.msra.mxu3 %v175_v42 }
  0x1f   :  { %132 = vmatpush.msra.mxu1 %v67_v35  ;;  %243 = vmatpush.msrb.mxu2 %v217_v59 }
  0x20   :  { %110 = vmatpush.msra.mxu0 %v50_v37  ;;  %197 = vmatpush.msra.mxu3 %v174_v47 }
  0x21   :  { %133 = vmatpush.msra.mxu1 %v66_v38  ;;  %244 = vmatpush.msrb.mxu2 %v216_v60 }
  0x22   :  { %111 = vmatpush.msra.mxu0 %v49_v40  ;;  %198 = vmatpush.msra.mxu3 %v173_v48 }
  0x23   :  { %134 = vmatpush.msra.mxu1 %v65_v41  ;;  %245 = vmatpush.msrb.mxu2 %v215_v61 }
  0x24   :  { %112 = vmatpush.msra.mxu0 %v48_v43  ;;  %199 = vmatpush.msra.mxu3 %v172_v51 }
  0x25   :  { %135 = vmatpush.msra.mxu1 %v64_v44  ;;  %113 = vmatmul.f32.vlgmr.msra.gmra.mxu0 %v42_v45 }
  0x26   :  { %136 = vmatmul.f32.vlgmr.msra.gmra.mxu1 %v43_v46  ;;  %200 = vmatpush.msra.mxu3 %v171_v52 }
  0x27   :  { %246 = vmatpush.msrb.mxu2 %v214_v13 }
  0x28   :  { %201 = vmatpush.msra.mxu3 %v170_v53 }
  0x29   :  { %247 = vmatpush.msrb.mxu2 %v213_v14 }
  0x2a   :  { %202 = vmatpush.msra.mxu3 %v169_v54 }
  0x2c   :  { %203 = vmatpush.msra.mxu3 %v168_v55 }
  0x2d   :  { %116 = vmatmul.f32.gmra.mxu0 %v45_v49 }
  0x2e   :  { %139 = vmatmul.f32.gmra.mxu1 %v46_v50 }
  0x90   :  { %v160_v63 = vpop.f32.mrf.mxu2 }
  0x98   :  { %v163_v9 = vpop.f32.mrf.mxu2 }
  0xa2   :  { %v114_v0 = vpop.f32.mrf.mxu0 }
  0xa3   :  { %v137_v1 = vpop.f32.mrf.mxu1  ;;  %v115_v2 = vadd.f32 %v271_v62, %v114_v0 }
  0xa5   :  { %v138_v3 = vadd.f32 %v137_v1, %v115_v2 }
  0xa7   :  { %v161_v4 = vadd.f32 %v160_v63, %v138_v3 }
  0xa9   :  { %v166_v5 = vmax.f32 %v161_v4, 0.0 }
  0xaa   :  { %v117_v6 = vpop.f32.mrf.mxu0 }
  0xab   :  { %v140_v7 = vpop.f32.mrf.mxu1  ;;  %v118_v8 = vadd.f32 %v271_v62, %v117_v6  ;;  %204 = vmatmul.f32.vlgmr.msra.gmra.mxu3 %v166_v5 }
  0xad   :  { %v141_v10 = vadd.f32 %v140_v7, %v118_v8 }
  0xaf   :  { %v164_v11 = vadd.f32 %v163_v9, %v141_v10 }
  0xb1   :  { %v167_v12 = vmax.f32 %v164_v11, 0.0 }
  0xb3   :  { %207 = vmatmul.f32.gmra.mxu3 %v167_v12 }
 0x12e   :  { %v205_v16 = vpop.f32.mrf.mxu3 }
 0x12f   :  { %v206_v17 = vadd.f32 %v272_v15, %v205_v16 }
 0x131   :  { %v211_v18 = vmax.f32 %v206_v17, 0.0 }
 0x133   :  { %266 = vmatmul.msk.f32.vlgmr.msrb.gmra.mxu2 %vm225_vm2, %v211_v18 }
 0x136   :  { %v208_v19 = vpop.f32.mrf.mxu3 }
 0x137   :  { %v209_v20 = vadd.f32 %v272_v15, %v208_v19 }
 0x139   :  { %v212_v21 = vmax.f32 %v209_v20, 0.0 }
 0x13b   :  { %267 = vmatmul.msk.f32.gmra.mxu2 %vm225_vm2, %v212_v21 }
 0x1b6   :  { %v249_v23 = vpop.f32.mrf.mxu2 }
 0x1b7   :  { %v250_v24 = vadd.f32 %v273_v22, %v249_v23 }
 0x1b9   :  { %256 = vst.msk [vmem:[%s460_s7] sm:$0xff] %vm255_vm3, %v250_v24 }
 0x1be   :  { %v252_v25 = vpop.f32.mrf.mxu2 }
 0x1bf   :  { %v253_v26 = vadd.f32 %v273_v22, %v252_v25 }
 0x1c1   :  { %257 = vst.msk [vmem:[%s460_s7 + $0x8] sm:$0xff] %vm255_vm3, %v253_v26 }
 0x1c2   :  { %262 = vsyncpa [#allocation3], 1 }

</bundles_post_ra>
